<compile_context>
chip_gen: v7x
topology: tpu7x:2x2x1
jax: 0.10.0
libtpu: 0.0.40
codegen_flags: <defaults>
</compile_context>

<pallas_src>
import jax
import jax.numpy as jnp
from jax.experimental import pallas as pl
from jax.experimental.pallas import tpu as pltpu


def text_mlp_forward(tokens, embed_table, w1, b1, w2, b2,
                     *, rows_per_tile=256, mxu_dtype=jnp.bfloat16):
    """tokens: (B, L) int32, embed_table: (V, D),
    w1: (D, H), b1: (H,), w2: (H, C), b2: (C,)  ->  (B, C) float32."""
    B, L = tokens.shape
    V, D = embed_table.shape
    H = w1.shape[1]
    C = w2.shape[1]

    LANE = 128
    Cp = ((C + LANE - 1) // LANE) * LANE          # pad class dim -> lane-dense store

    # Batch tiling: collapse everything into one grid step unless B*L gets large
    # (then tile ~rows_per_tile token rows per step, sublane-aligned).
    TB = max(1, rows_per_tile // L)
    if TB >= B:
        TB, num_tiles = B, 1
    else:
        TB = max(8, (TB // 8) * 8)
        num_tiles = -(-B // TB)
    B_pad = TB * num_tiles
    TBL = TB * L

    tok = tokens.astype(jnp.int32)
    if B_pad != B:
        tok = jnp.pad(tok, ((0, B_pad - B), (0, 0)))      # padded rows use token 0
    tok_flat = tok.reshape(B_pad * L, 1)                   # (B_pad*L, 1) for the kernel

    # bf16 MXU operands, f32 biases / accumulation.
    emb_m = embed_table.astype(mxu_dtype)
    w1_m = w1.astype(mxu_dtype)
    w2_p = jnp.zeros((H, Cp), mxu_dtype).at[:, :C].set(w2.astype(mxu_dtype))
    b1_2d = b1.reshape(1, H).astype(jnp.float32)
    b2_p = jnp.zeros((1, Cp), jnp.float32).at[:, :C].set(b2.astype(jnp.float32))

    def kernel(tok_ref, emb_ref, w1_ref, b1_ref, w2_ref, b2_ref, out_ref):
        # --- fused embedding gather: one-hot(tokens) @ table, runs on the MXU ---
        # TODO(synk): for production-scale vocab (V >> a few thousand) replace the
        # full-table one-hot gather with a scalar-prefetch / make_async_copy row
        # gather so the table is not fully VMEM-resident.
        tok_ids = tok_ref[...]                                          # (TBL, 1) i32
        vocab_ids = jax.lax.broadcasted_iota(jnp.int32, (TBL, V), 1)    # (TBL, V)
        onehot = jnp.where(vocab_ids == tok_ids, 1.0, 0.0).astype(emb_ref.dtype)
        e = jnp.dot(onehot, emb_ref[...],
                    preferred_element_type=jnp.float32)                 # (TBL, D) f32

        # --- fc1 + ReLU: one batched matmul over all TB*L token rows ---
        h = jnp.dot(e.astype(w1_ref.dtype), w1_ref[...],
                    preferred_element_type=jnp.float32)                 # (TBL, H) f32
        h = jnp.maximum(h + b1_ref[...], 0.0)

        # --- permute + max_pool1d(kernel=L) == global max over the sequence axis ---
        pooled = jnp.max(h.reshape(TB, L, H), axis=1)                   # (TB, H) f32

        # --- fc2: one batched matmul; Cp=128 keeps the output store lane-dense ---
        y = jnp.dot(pooled.astype(w2_ref.dtype), w2_ref[...],
                    preferred_element_type=jnp.float32)                 # (TB, Cp)
        out_ref[...] = (y + b2_ref[...]).astype(out_ref.dtype)

    grid_spec = pltpu.PrefetchScalarGridSpec(
        num_scalar_prefetch=0,
        grid=(num_tiles,),
        in_specs=[
            pl.BlockSpec((TBL, 1), lambda i: (i, 0)),     # token ids for this tile
            pl.BlockSpec((V, D), lambda i: (0, 0)),       # embedding table (resident)
            pl.BlockSpec((D, H), lambda i: (0, 0)),       # w1 (resident)
            pl.BlockSpec((1, H), lambda i: (0, 0)),       # b1
            pl.BlockSpec((H, Cp), lambda i: (0, 0)),      # w2 (lane-padded, resident)
            pl.BlockSpec((1, Cp), lambda i: (0, 0)),      # b2 (lane-padded)
        ],
        out_specs=pl.BlockSpec((TB, Cp), lambda i: (i, 0)),
    )

    out_padded = pl.pallas_call(
        kernel,
        out_shape=jax.ShapeDtypeStruct((B_pad, Cp), jnp.float32),
        grid_spec=grid_spec,
        compiler_params=pltpu.CompilerParams(
            dimension_semantics=("parallel",),
            vmem_limit_bytes=32 * 1024 * 1024,
        ),
    )(tok_flat, emb_m, w1_m, b1_2d, w2_p, b2_p)

    return out_padded[:B, :C]


# Pure-f32 reference: exact semantics of the PyTorch module.
def text_mlp_reference_f32(tokens, embed_table, w1, b1, w2, b2):
    emb = jnp.take(embed_table, tokens.astype(jnp.int32), axis=0)    # (B, L, D)
    h = jnp.maximum(emb @ w1 + b1, 0.0)                              # (B, L, H)
    pooled = jnp.max(h, axis=1)                                      # (B, H)
    return pooled @ w2 + b2                                          # (B, C)


# Reference that mirrors the kernel's bf16 MXU operands + f32 accumulation.
def text_mlp_reference_mxu(tokens, embed_table, w1, b1, w2, b2, mxu_dtype=jnp.bfloat16):
    B, L = tokens.shape
    emb = jnp.take(embed_table.astype(mxu_dtype),
                   tokens.astype(jnp.int32).reshape(-1), axis=0)     # (B*L, D) bf16
    h = jnp.dot(emb, w1.astype(mxu_dtype),
                preferred_element_type=jnp.float32) + b1
    h = jnp.maximum(h, 0.0).reshape(B, L, -1)
    pooled = jnp.max(h, axis=1)                                      # (B, H) f32
    return jnp.dot(pooled.astype(mxu_dtype), w2.astype(mxu_dtype),
                   preferred_element_type=jnp.float32) + b2


if __name__ == "__main__":
    # Small synthetic shapes consistent with the module:
    #   vocab=64, embedding_dim=50, hidden=100, class_num=2, batch=2, seq=8
    VOCAB, D, H, C = 64, 50, 100, 2
    B, L = 2, 8

    key = jax.random.PRNGKey(0)
    k_emb, k_w1, k_b1, k_w2, k_b2, k_tok = jax.random.split(key, 6)

    # Deterministic "pretrained" word2vec-style embedding table and MLP params.
    embed_table = jax.random.normal(k_emb, (VOCAB, D), dtype=jnp.float32) * 0.1
    w1 = jax.random.normal(k_w1, (D, H), dtype=jnp.float32) * 0.1
    b1 = jax.random.normal(k_b1, (H,), dtype=jnp.float32) * 0.1
    w2 = jax.random.normal(k_w2, (H, C), dtype=jnp.float32) * 0.1
    b2 = jax.random.normal(k_b2, (C,), dtype=jnp.float32) * 0.1

    tokens = jax.random.randint(k_tok, (B, L), 0, VOCAB, dtype=jnp.int32)

    out = text_mlp_forward(tokens, embed_table, w1, b1, w2, b2)
    out = jax.block_until_ready(out)
    assert out.shape == (B, C), out.shape

    # Strict check vs a reference that uses the same bf16 MXU operands.
    ref_mxu = text_mlp_reference_mxu(tokens, embed_table, w1, b1, w2, b2)
    assert jnp.allclose(out, ref_mxu, atol=1e-3, rtol=1e-3), (out, ref_mxu)

    # Loose check vs the pure-f32 module semantics (only bf16 weight rounding differs).
    ref_f32 = text_mlp_reference_f32(tokens, embed_table, w1, b1, w2, b2)
    assert jnp.allclose(out, ref_f32, atol=3e-2, rtol=3e-2), (out, ref_f32)

    print("KERNEL_OK")
</pallas_src>

<mosaic_0001>
module attributes {stable_mosaic.version = 11 : i64} {
  func.func @kernel(%arg0: i32, %arg1: memref<16x1xi32, #tpu.memory_space<vmem>>, %arg2: memref<64x50xbf16, #tpu.memory_space<vmem>>, %arg3: memref<50x100xbf16, #tpu.memory_space<vmem>>, %arg4: memref<1x100xf32, #tpu.memory_space<vmem>>, %arg5: memref<100x128xbf16, #tpu.memory_space<vmem>>, %arg6: memref<1x128xf32, #tpu.memory_space<vmem>>, %arg7: memref<2x128xf32, #tpu.memory_space<vmem>>) attributes {dimension_semantics = [#tpu.dimension_semantics<parallel>], iteration_bounds = array<i64: 1>, scalar_prefetch = 0 : i64, scratch_operands = 0 : i64, tpu.core_type = #tpu.core_type<tc>, window_params = [{transform_indices = @transform_0, window_bounds = array<i64: 16, 1>}, {pipeline_mode = #tpu.pipeline_mode<synchronous>, transform_indices = @transform_1, window_bounds = array<i64: 64, 50>}, {pipeline_mode = #tpu.pipeline_mode<synchronous>, transform_indices = @transform_2, window_bounds = array<i64: 50, 100>}, {pipeline_mode = #tpu.pipeline_mode<synchronous>, transform_indices = @transform_3, window_bounds = array<i64: 1, 100>}, {pipeline_mode = #tpu.pipeline_mode<synchronous>, transform_indices = @transform_4, window_bounds = array<i64: 100, 128>}, {pipeline_mode = #tpu.pipeline_mode<synchronous>, transform_indices = @transform_5, window_bounds = array<i64: 1, 128>}, {transform_indices = @transform_6, window_bounds = array<i64: 2, 128>}]} {
    %c0 = arith.constant 0 : index
    %c0_0 = arith.constant 0 : index
    %0 = vector.load %arg1[%c0, %c0_0] : memref<16x1xi32, #tpu.memory_space<vmem>>, vector<16x1xi32>
    %1 = tpu.iota {dimensions = array<i32: 1>} : vector<16x64xi32>
    %2 = vector.broadcast %0 : vector<16x1xi32> to vector<16x64xi32>
    %3 = arith.cmpi eq, %1, %2 : vector<16x64xi32>
    %cst = arith.constant 1.000000e+00 : f32
    %cst_1 = arith.constant 0.000000e+00 : f32
    %4 = vector.broadcast %cst : f32 to vector<16x64xf32>
    %5 = vector.broadcast %cst_1 : f32 to vector<16x64xf32>
    %6 = arith.select %3, %4, %5 : vector<16x64xi1>, vector<16x64xf32>
    %7 = arith.truncf %6 : vector<16x64xf32> to vector<16x64xbf16>
    %c0_2 = arith.constant 0 : index
    %c0_3 = arith.constant 0 : index
    %8 = vector.load %arg2[%c0_2, %c0_3] : memref<64x50xbf16, #tpu.memory_space<vmem>>, vector<64x50xbf16>
    %cst_4 = arith.constant dense<0.000000e+00> : vector<16x50xf32>
    %9 = tpu.matmul %7, %8, %cst_4 {dimension_numbers = #tpu.dot_dimension_numbers<[1], [0], [0], [1], [0, 0, 1, 1], [], []>} : vector<16x64xbf16>, vector<64x50xbf16>, vector<16x50xf32> -> vector<16x50xf32>
    %10 = arith.truncf %9 : vector<16x50xf32> to vector<16x50xbf16>
    %c0_5 = arith.constant 0 : index
    %c0_6 = arith.constant 0 : index
    %11 = vector.load %arg3[%c0_5, %c0_6] : memref<50x100xbf16, #tpu.memory_space<vmem>>, vector<50x100xbf16>
    %cst_7 = arith.constant dense<0.000000e+00> : vector<16x100xf32>
    %12 = tpu.matmul %10, %11, %cst_7 {dimension_numbers = #tpu.dot_dimension_numbers<[1], [0], [0], [1], [0, 0, 1, 1], [], []>} : vector<16x50xbf16>, vector<50x100xbf16>, vector<16x100xf32> -> vector<16x100xf32>
    %c0_8 = arith.constant 0 : index
    %c0_9 = arith.constant 0 : index
    %13 = vector.load %arg4[%c0_8, %c0_9] : memref<1x100xf32, #tpu.memory_space<vmem>>, vector<1x100xf32>
    %14 = vector.broadcast %13 : vector<1x100xf32> to vector<16x100xf32>
    %15 = arith.addf %12, %14 : vector<16x100xf32>
    %cst_10 = arith.constant 0.000000e+00 : f32
    %16 = vector.broadcast %cst_10 : f32 to vector<16x100xf32>
    %17 = arith.maximumf %15, %16 : vector<16x100xf32>
    %18 = vector.shape_cast %17 : vector<16x100xf32> to vector<2x8x100xf32>
    %cst_11 = arith.constant dense<0xFF800000> : vector<2x100xf32>
    %19 = vector.multi_reduction <maximumf>, %18, %cst_11 [1] : vector<2x8x100xf32> to vector<2x100xf32>
    %20 = arith.truncf %19 : vector<2x100xf32> to vector<2x100xbf16>
    %c0_12 = arith.constant 0 : index
    %c0_13 = arith.constant 0 : index
    %21 = vector.load %arg5[%c0_12, %c0_13] : memref<100x128xbf16, #tpu.memory_space<vmem>>, vector<100x128xbf16>
    %cst_14 = arith.constant dense<0.000000e+00> : vector<2x128xf32>
    %22 = tpu.matmul %20, %21, %cst_14 {dimension_numbers = #tpu.dot_dimension_numbers<[1], [0], [0], [1], [0, 0, 1, 1], [], []>} : vector<2x100xbf16>, vector<100x128xbf16>, vector<2x128xf32> -> vector<2x128xf32>
    %c0_15 = arith.constant 0 : index
    %c0_16 = arith.constant 0 : index
    %23 = vector.load %arg6[%c0_15, %c0_16] : memref<1x128xf32, #tpu.memory_space<vmem>>, vector<1x128xf32>
    %24 = vector.broadcast %23 : vector<1x128xf32> to vector<2x128xf32>
    %25 = arith.addf %22, %24 : vector<2x128xf32>
    %c0_17 = arith.constant 0 : index
    %c0_18 = arith.constant 0 : index
    %26 = vector.load %arg7[%c0_17, %c0_18] : memref<2x128xf32, #tpu.memory_space<vmem>>, vector<2x128xf32>
    tpu.vector_store %arg7[%c0_17, %c0_18], %25 {strides = array<i32>} : memref<2x128xf32, #tpu.memory_space<vmem>>, vector<2x128xf32>,
    return
  }
  func.func @transform_0(%arg0: i32) -> (i32, i32) {
    %c0_i32 = arith.constant 0 : i32
    %c0_i32_0 = arith.constant 0 : i32
    return %arg0, %c0_i32 : i32, i32
  }
  func.func @transform_1(%arg0: i32) -> (i32, i32) {
    %c0_i32 = arith.constant 0 : i32
    %c0_i32_0 = arith.constant 0 : i32
    %c0_i32_1 = arith.constant 0 : i32
    return %c0_i32, %c0_i32_0 : i32, i32
  }
  func.func @transform_2(%arg0: i32) -> (i32, i32) {
    %c0_i32 = arith.constant 0 : i32
    %c0_i32_0 = arith.constant 0 : i32
    %c0_i32_1 = arith.constant 0 : i32
    return %c0_i32, %c0_i32_0 : i32, i32
  }
  func.func @transform_3(%arg0: i32) -> (i32, i32) {
    %c0_i32 = arith.constant 0 : i32
    %c0_i32_0 = arith.constant 0 : i32
    %c0_i32_1 = arith.constant 0 : i32
    return %c0_i32, %c0_i32_0 : i32, i32
  }
  func.func @transform_4(%arg0: i32) -> (i32, i32) {
    %c0_i32 = arith.constant 0 : i32
    %c0_i32_0 = arith.constant 0 : i32
    %c0_i32_1 = arith.constant 0 : i32
    return %c0_i32, %c0_i32_0 : i32, i32
  }
  func.func @transform_5(%arg0: i32) -> (i32, i32) {
    %c0_i32 = arith.constant 0 : i32
    %c0_i32_0 = arith.constant 0 : i32
    %c0_i32_1 = arith.constant 0 : i32
    return %c0_i32, %c0_i32_0 : i32, i32
  }
  func.func @transform_6(%arg0: i32) -> (i32, i32) {
    %c0_i32 = arith.constant 0 : i32
    %c0_i32_0 = arith.constant 0 : i32
    return %arg0, %c0_i32 : i32, i32
  }
}

</mosaic_0001>

<bundles_post_ra>
// kernel: tpu_custom_call.1
= control target key start
LH: loop header
LB: loop body
LE: loop exit
PB: predicated region body
PF: predicated region fallthrough
CT: control target
= control target key end

     0   :  { %v473_v1 = vmov 0   ;;  %v474_v2 = vmov 0.0   ;;  %vm475_vm0 = vmmov 0   ;;  %s607_s0 = inlined_call_operand.vmem [shape: s32[16,1], index: 0, kind: input, shape index: {}]   ;;  %s608_s1 = inlined_call_operand.vmem [shape: bf16[64,50], index: 1, kind: input, shape index: {}]   ;;  %s609_s2 = inlined_call_operand.vmem [shape: bf16[50,100], index: 2, kind: input, shape index: {}]   ;;  %s610_s3 = inlined_call_operand.vmem [shape: f32[1,100], index: 3, kind: input, shape index: {}]   ;;  %s611_s4 = inlined_call_operand.vmem [shape: bf16[100,128], index: 4, kind: input, shape index: {}]   ;;  %s612_s5 = inlined_call_operand.vmem [shape: f32[1,128], index: 5, kind: input, shape index: {}]   ;;  %s613_s6 = inlined_call_operand.hbm [shape: f32[2,128], index: 6, kind: output, shape index: {}]  }
   0x1   :  { %v25_v0 = vld [vmem:[%s607_s0] sm:$0xff]  ;;  %433 = vset.pattern.permute.xlu0 %v473_v1  ;;  %387 = vmatprep.subr.bf16.mxu1 %v474_v2  ;;  %v26_v4 = vld [vmem:[%s607_s0 + $0x8] sm:$0xff]  ;;  %v436_v6 = vld [vmem:[%s608_s1 + $0x10] sm:$0xff]  }
   0x2   :  { %v434_v3 = vld [vmem:[%s608_s1] sm:$0xff]   ;;  %30 = vperm.xlu0 %433, %v25_v0   ;;  %411 = vmatprep.subr.bf16.mxu0 %v474_v2  ;;  %v435_v5 = vld [vmem:[%s608_s1 + $0x8] sm:$0xff]   ;;  %v437_v7 = vld [vmem:[%s608_s1 + $0x18] sm:$0xff]  }
   0x3   :  { %388 = vmatpush3.bf16.msra.mxu1 %v434_v3  ;;  %395 = vmatprep.mubr.msk.bf16.mxu1 %vm475_vm0, %v474_v2 }
   0x4   :  { %389 = vmatprep.subr.bf16.mxu1 %v474_v2  ;;  %425 = vmatprep.mubr.msk.bf16.mxu0 %vm475_vm0, %v474_v2 }
   0x6   :  { %33 = vperm.xlu0 %433, %v26_v4  }
   0x7   :  { %390 = vmatpush3.bf16.msra.mxu1 %v435_v5 }
   0x8   :  { %391 = vmatprep.subr.bf16.mxu1 %v474_v2 }
   0xb   :  { %392 = vmatpush3.bf16.msra.mxu1 %v436_v6 }
   0xc   :  { %393 = vmatprep.subr.bf16.mxu1 %v474_v2 }
   0xd   :  { %11 = vsyncpa [#allocation3], 0  ;;  %v27_v8 = vlaneseq  ;;  %vm72_vm3 = vcmask 523264   ;;  %v438_v14 = vld [vmem:[%s609_s2] sm:$0xff]   ;;  %v439_v16 = vld [vmem:[%s609_s2 + $0x8] sm:$0xff]   ;;  %vm157_vm4 = vcmask 1040384  }
   0xe   :  { %v440_v17 = vld [vmem:[%s609_s2 + $0x10] sm:$0xff]   ;;  %v441_v18 = vld [vmem:[%s609_s2 + $0x18] ss:$0 sps:$4 sm:$0x11]   ;;  %vm153_vm5 = vcmask 408576   ;;  %v442_v25 = vld [vmem:[%s611_s4] sm:$0xff]  }
   0xf   :  { %394 = vmatpush3.bf16.msra.mxu1 %v437_v7  ;;  %v28_v9 = vand.u32 127, %v27_v8  ;;  %v159_v19 = vsel %vm157_vm4, %v441_v18, 0  ;;  %412 = vmatpush3.bf16.msra.mxu0 %v442_v25  ;;  %v443_v26 = vld [vmem:[%s611_s4 + $0x8] sm:$0xff]   ;;  %v444_v27 = vld [vmem:[%s611_s4 + $0x10] sm:$0xff]   ;;  %v445_v28 = vld [vmem:[%s611_s4 + $0x18] sm:$0xff]   ;;  %vm290_vm6 = vcmask 1041408  }
  0x10   :  { %399 = vmatprep.subr.bf16.mxu1 %v474_v2  ;;  %413 = vmatprep.subr.bf16.mxu0 %v474_v2  ;;  %v446_v29 = vld [vmem:[%s611_s4 + $0x20] sm:$0xff]   ;;  %v447_v30 = vld [vmem:[%s611_s4 + $0x28] sm:$0xff]   ;;  %v448_v31 = vld [vmem:[%s611_s4 + $0x30] ss:$0 sps:$4 sm:$0x33]   ;;  %vm204_vm7 = vcmask 818176  }
  0x11   :  { %v292_v32 = vsel %vm290_vm6, %v448_v31, 0  ;;  %v354_v33 = vld [vmem:[%s610_s3] ss:$0 sm:$0xff]  ;;  %vm245_vm8 = vcmask 1041409   ;;  %s476_s30 = smov [#allocation2]  }
  0x12   :  { %v360_v62 = vld [vmem:[%s612_s5] ss:$0 sm:$0xff]  ;;  %s341_s0 = sshll.u32 %s476_s30, 4  ;;  %s342_s0 = int_to_ptr.vmem [resolvable:$true] %s341_s0 }
  0x13   :  { %414 = vmatpush3.bf16.msra.mxu0 %v443_v26  ;;  %s449_s7 = scalar_lea.vmem %s342_s0, 32  ;;  %p454_p1 = scmp.lt.s32.totalorder %s342_s0, %s342_s0 }
  0x14   :  { %415 = vmatprep.subr.bf16.mxu0 %v474_v2  ;;  %p450_p0 = scmp.ne.s32.totalorder %s342_s0, %s449_s7  ;;  %p455_p2 = scmp.lt.s32.totalorder %s449_s7, %s449_s7 }
  0x16   :  { %p456_p3 = por %p455_p2, %p454_p1 }
  0x17   :  { %416 = vmatpush3.bf16.msra.mxu0 %v444_v27 }
  0x18   :  { %417 = vmatprep.subr.bf16.mxu0 %v474_v2  ;;  %p457_p4 = pnand %p456_p3, %p450_p0 }
  0x1b   :  { %418 = vmatpush3.bf16.msra.mxu0 %v445_v28 }
  0x1c   :  { %419 = vmatprep.subr.bf16.mxu0 %v474_v2 }
  0x1f   :  { %420 = vmatpush3.bf16.msra.mxu0 %v446_v29 }
  0x20   :  { %421 = vmatprep.subr.bf16.mxu0 %v474_v2 }
  0x23   :  { %422 = vmatpush3.bf16.msra.mxu0 %v447_v30 }
  0x24   :  { %423 = vmatprep.subr.bf16.mxu0 %v474_v2 }
  0x27   :  { %424 = vmatpush3.bf16.msra.mxu0 %v292_v32 }
  0x81   :  { %v31_v10 = vpop.permute.xlu0 %30 }
  0x82   :  { %vm35_vm1 = vcmp.eq.s32.totalorder %v28_v9, %v31_v10 }
  0x83   :  { %v37_v12 = vsel %vm35_vm1, 1.0, %v474_v2 }
  0x85   :  { %v34_v11 = vpop.permute.xlu0 %33 }
  0x86   :  { %vm36_vm2 = vcmp.eq.s32.totalorder %v28_v9, %v34_v11 }
  0x87   :  { %v38_v13 = vsel %vm36_vm2, 1.0, %v474_v2 }
  0x88   :  { %v39_v15 = vpack.c.bf16 %v38_v13, %v37_v12 }
  0x8a   :  { %396 = vmatmul.mubr.msk.bf16.vlgmr.msra.gmra.mrb[0].mxu1 %vm72_vm3, %v39_v15 }
  0x8b   :  { %400 = vmatpush3.bf16.msra.mxu1 %v438_v14  ;;  %407 = vmatprep.mubr.msk.bf16.mxu1 %vm475_vm0, %v474_v2 }
  0x8c   :  { %401 = vmatprep.subr.bf16.mxu1 %v474_v2 }
  0x8f   :  { %402 = vmatpush3.bf16.msra.mxu1 %v439_v16 }
  0x90   :  { %403 = vmatprep.subr.bf16.mxu1 %v474_v2 }
  0x93   :  { %404 = vmatpush3.bf16.msra.mxu1 %v440_v17 }
  0x94   :  { %405 = vmatprep.subr.bf16.mxu1 %v474_v2 }
  0x97   :  { %406 = vmatpush3.bf16.msra.mxu1 %v159_v19 }
 0x15d   :  { %v110_v20 = vpop.f32.mrb[0].mxu1 }
 0x15e   :  { %v397_v21 = vpop.f32.mrb[1].mxu1 }
 0x15f   :  { %v113_v22 = vpop.f32.mrb[2].mxu1 }
 0x160   :  { %v117_v23 = vpack.c.bf16 %v113_v22, %v110_v20  ;;  %v398_v24 = vpop.f32.mrb[3].mxu1 }
 0x162   :  { %408 = vmatmul.mubr.msk.bf16.vlgmr.msra.gmra.mrb[4].mxu1 %vm153_vm5, %v117_v23 }
 0x235   :  { %v195_v34 = vpop.f32.mrb[4].mxu1 }
 0x236   :  { %v196_v35 = vadd.f32 %v354_v33, %v195_v34  ;;  %v409_v36 = vpop.f32.mrb[5].mxu1 }
 0x237   :  { %v198_v37 = vpop.f32.mrb[6].mxu1 }
 0x238   :  { %v202_v38 = vmax.f32 %v196_v35, 0.0  ;;  %v199_v39 = vadd.f32 %v354_v33, %v198_v37  ;;  %v410_v40 = vpop.f32.mrb[7].mxu1 }
 0x23a   :  { %v205_v41 = vsel %vm204_vm7, %v202_v38, -inf  ;;  %v203_v42 = vmax.f32 %v199_v39, 0.0 }
 0x23b   :  { %v206_v43 = vrot.slane %v205_v41, 4 }
 0x23c   :  { %v212_v44 = vsel %vm204_vm7, %v203_v42, -inf }
 0x23d   :  { %v207_v45 = vmax.f32 %v205_v41, %v206_v43  ;;  %v213_v46 = vrot.slane %v212_v44, 4 }
 0x23f   :  { %v208_v47 = vrot.slane %v207_v45, 2  ;;  %v214_v48 = vmax.f32 %v212_v44, %v213_v46 }
 0x241   :  { %v209_v49 = vmax.f32 %v207_v45, %v208_v47  ;;  %v215_v50 = vrot.slane %v214_v48, 2 }
 0x243   :  { %v210_v51 = vrot.slane %v209_v49, 1  ;;  %v216_v52 = vmax.f32 %v214_v48, %v215_v50 }
 0x245   :  { %v211_v53 = vmax.f32 %v209_v49, %v210_v51  ;;  %v217_v54 = vrot.slane %v216_v52, 1 }
 0x247   :  { %v219_v55 = vpack.c.bf16 %v211_v53, %v211_v53  ;;  %v218_v56 = vmax.f32 %v216_v52, %v217_v54 }
 0x249   :  { %v220_v57 = vpack.c.bf16 %v218_v56, %v218_v56  ;;  %v243_v58 = vunpack.c.l.b16 %v219_v55 }
 0x24b   :  { %v244_v59 = vunpack.c.l.b16 %v220_v57 }
 0x24d   :  { %v246_v60 = vsel %vm245_vm8, %v244_v59, %v243_v58 }
 0x24e   :  { %v247_v61 = vpack.c.b16 %v246_v60, %v246_v60 }
 0x250   :  { %426 = vmatmul.mubr.msk.bf16.vlgmr.msra.gmra.mrb[0].mxu0 %vm204_vm7, %v247_v61 }
 0x323   :  { %v328_v63 = vpop.f32.mrb[0].mxu0 }
 0x324   :  { %v329_v0 = vadd.f32 %v360_v62, %v328_v63  ;;  %v427_v1 = vpop.f32.mrb[1].mxu0 }
 0x325   :  { %v331_v2 = vpop.f32.mrb[2].mxu0 }
 0x326   :  { %334 = vst [vmem:[#allocation2] sm:$0x3] %v329_v0  ;;  %v428_v3 = vpop.f32.mrb[3].mxu0 }
 0x327   :  { %460 = shalt.err (!%p457_p4)
}
 0x328   :  { %s461_s5 = scalar_lea.hbm %s613_s6, 32 }
 0x329   :  { %p462_p5 = scmp.ne.s32.totalorder %s613_s6, %s461_s5  ;;  %p465_p6 = scmp.lt.u32.totalorder %s461_s5, %s613_s6 }
 0x32b   :  { %p467_p7 = pnand %p465_p6, %p462_p5 }
 0x32d   :  { %470 = shalt.err (!%p467_p7)
}
 0x32e   :  { %344 = dma.vmem_to_hbm [thread:$0]  %s342_s0, 32, %s613_s6, [#allocation3]  }
 0x32f   :  { %471 = dma.done.wait [#allocation3], 32  }
 0x330   :  { %472 = vsyncadd [#allocation3], 4294967264 }
 0x331   :  { %348 = vsyncpa [#allocation3], 1 }

</bundles_post_ra>
